<compile_context>
chip_gen: v6e
topology: v6e:2x2x1
jax: 0.10.0
libtpu: 0.0.40
codegen_flags: <defaults>
</compile_context>

<pallas_src>
import math
from functools import partial

import jax
import jax.numpy as jnp
from jax.experimental import pallas as pl
from jax.experimental.pallas import tpu as pltpu


def _ada_ln_kernel(x_ref, scale_ref, shift_ref, o_ref, *, eps):
    """x_ref: (1, TT, D); scale/shift: (1, 1, D); o_ref: (1, TT, D)."""
    x = x_ref[0].astype(jnp.float32)                       # (TT, D)
    mean = jnp.mean(x, axis=-1, keepdims=True)             # lane reduce (XLU)
    xc = x - mean
    var = jnp.mean(xc * xc, axis=-1, keepdims=True)        # biased var (torch LN)
    xhat = xc * jax.lax.rsqrt(var + eps)                   # EUP rsqrt
    scale = scale_ref[0].astype(jnp.float32)               # (1, D) -> broadcasts
    shift = shift_ref[0].astype(jnp.float32)
    o_ref[0] = (xhat * (1.0 + scale) + shift).astype(o_ref.dtype)


def _timestep_scale_shift(timestep, w, b, n_embd, label_emb=None):
    """SinusoidalPosEmb -> (+label_emb) -> SiLU -> Linear -> split. O(B*D)."""
    half = n_embd // 2
    freqs = jnp.exp(
        jnp.arange(half, dtype=jnp.float32) * (-math.log(10000.0) / (half - 1)))
    emb = timestep.astype(jnp.float32)[:, None] * freqs[None, :]
    emb = jnp.concatenate([jnp.sin(emb), jnp.cos(emb)], axis=-1)       # (B, D)
    if label_emb is not None:
        emb = emb + label_emb.astype(jnp.float32)
    emb = jax.nn.silu(emb)
    emb = emb @ w.astype(jnp.float32) + b.astype(jnp.float32)          # (B, 2D)
    scale, shift = jnp.split(emb, 2, axis=-1)
    return scale[:, None, :], shift[:, None, :]                        # (B,1,D)


def _seq_tile(T, D, itemsize):
    """Largest seq tile that keeps one x block <= ~2 MiB (v7x-safe), mult of 8."""
    budget = 2 << 20
    if T * D * itemsize <= budget or T % 8 != 0:
        return T                         # whole sequence in one block
    tt = (budget // (D * itemsize)) // 8 * 8
    return int(max(8, min(T, tt)))


def ada_layer_norm(x, timestep, w, b, label_emb=None, eps=1e-5):
    """x: (B, T, D); timestep: (B,); w: (D, 2D) (= torch weight.T); b: (2D,)."""
    B, T, D = x.shape
    scale, shift = _timestep_scale_shift(timestep, w, b, D, label_emb)

    tt = _seq_tile(T, D, x.dtype.itemsize)
    grid = (B, pl.cdiv(T, tt))

    return pl.pallas_call(
        partial(_ada_ln_kernel, eps=eps),
        out_shape=jax.ShapeDtypeStruct((B, T, D), x.dtype),
        grid=grid,
        in_specs=[
            pl.BlockSpec((1, tt, D), lambda bi, ti: (bi, ti, 0)),   # x tile
            pl.BlockSpec((1, 1, D), lambda bi, ti: (bi, 0, 0)),     # scale[b]
            pl.BlockSpec((1, 1, D), lambda bi, ti: (bi, 0, 0)),     # shift[b]
        ],
        out_specs=pl.BlockSpec((1, tt, D), lambda bi, ti: (bi, ti, 0)),
        compiler_params=pltpu.CompilerParams(
            dimension_semantics=("parallel", "parallel")),
    )(x, scale, shift)


def _ada_layer_norm_ref(x, timestep, w, b, label_emb=None, eps=1e-5):
    """Pure-JAX reference mirroring the PyTorch module."""
    B, T, D = x.shape
    scale, shift = _timestep_scale_shift(timestep, w, b, D, label_emb)
    xf = x.astype(jnp.float32)
    mean = jnp.mean(xf, axis=-1, keepdims=True)
    var = jnp.mean((xf - mean) ** 2, axis=-1, keepdims=True)
    xhat = (xf - mean) / jnp.sqrt(var + eps)
    return (xhat * (1.0 + scale) + shift).astype(x.dtype)


if __name__ == "__main__":
    # Small shapes: batch=2, seq=16, n_embd=128 (hidden kept a multiple of 128
    # so the lane dim is dense).
    B, T, D = 2, 16, 128

    key = jax.random.PRNGKey(0)
    kx, kw, kb, kt, kl = jax.random.split(key, 5)
    x = jax.random.normal(kx, (B, T, D), dtype=jnp.float32)
    w = jax.random.normal(kw, (D, 2 * D), dtype=jnp.float32) * 0.02  # Linear W^T
    b = jax.random.normal(kb, (2 * D,), dtype=jnp.float32) * 0.02    # Linear bias
    timestep = jax.random.randint(kt, (B,), 0, 1000).astype(jnp.float32)
    label_emb = jax.random.normal(kl, (B, D), dtype=jnp.float32)

    out = ada_layer_norm(x, timestep, w, b, label_emb)
    jax.block_until_ready(out)

    ref = _ada_layer_norm_ref(x, timestep, w, b, label_emb)
    assert out.shape == (B, T, D)
    assert jnp.allclose(out, ref, atol=1e-4, rtol=1e-4), (
        float(jnp.max(jnp.abs(out - ref))))

    # Also exercise the label_emb=None path.
    out2 = ada_layer_norm(x, timestep, w, b, None)
    ref2 = _ada_layer_norm_ref(x, timestep, w, b, None)
    jax.block_until_ready(out2)
    assert jnp.allclose(out2, ref2, atol=1e-4, rtol=1e-4)

    print("KERNEL_OK")
</pallas_src>

<mosaic_0001>
module attributes {stable_mosaic.version = 11 : i64} {
  func.func @_ada_ln_kernel(%arg0: i32, %arg1: i32, %arg2: memref<1x16x128xf32, #tpu.memory_space<vmem>>, %arg3: memref<1x1x128xf32, #tpu.memory_space<vmem>>, %arg4: memref<1x1x128xf32, #tpu.memory_space<vmem>>, %arg5: memref<1x16x128xf32, #tpu.memory_space<vmem>>) attributes {dimension_semantics = [#tpu.dimension_semantics<parallel>, #tpu.dimension_semantics<parallel>], iteration_bounds = array<i64: 2, 1>, scalar_prefetch = 0 : i64, scratch_operands = 0 : i64, tpu.core_type = #tpu.core_type<tc>, window_params = [{transform_indices = @transform_0, window_bounds = array<i64: 1, 16, 128>}, {transform_indices = @transform_1, window_bounds = array<i64: 1, 1, 128>}, {transform_indices = @transform_2, window_bounds = array<i64: 1, 1, 128>}, {transform_indices = @transform_3, window_bounds = array<i64: 1, 16, 128>}]} {
    %c0 = arith.constant 0 : index
    %c0_0 = arith.constant 0 : index
    %c0_1 = arith.constant 0 : index
    %0 = vector.load %arg2[%c0, %c0_0, %c0_1] : memref<1x16x128xf32, #tpu.memory_space<vmem>>, vector<1x16x128xf32>
    %1 = vector.shape_cast %0 : vector<1x16x128xf32> to vector<16x128xf32>
    %cst = arith.constant dense<0.000000e+00> : vector<16xf32>
    %2 = vector.multi_reduction <add>, %1, %cst [1] : vector<16x128xf32> to vector<16xf32>
    %3 = vector.shape_cast %2 : vector<16xf32> to vector<16x1xf32>
    %cst_2 = arith.constant 1.280000e+02 : f32
    %4 = vector.broadcast %cst_2 : f32 to vector<16x1xf32>
    %5 = arith.divf %3, %4 : vector<16x1xf32>
    %6 = vector.broadcast %5 : vector<16x1xf32> to vector<16x128xf32>
    %7 = arith.subf %1, %6 : vector<16x128xf32>
    %8 = arith.mulf %7, %7 : vector<16x128xf32>
    %cst_3 = arith.constant dense<0.000000e+00> : vector<16xf32>
    %9 = vector.multi_reduction <add>, %8, %cst_3 [1] : vector<16x128xf32> to vector<16xf32>
    %10 = vector.shape_cast %9 : vector<16xf32> to vector<16x1xf32>
    %cst_4 = arith.constant 1.280000e+02 : f32
    %11 = vector.broadcast %cst_4 : f32 to vector<16x1xf32>
    %12 = arith.divf %10, %11 : vector<16x1xf32>
    %cst_5 = arith.constant 9.99999974E-6 : f32
    %13 = vector.broadcast %cst_5 : f32 to vector<16x1xf32>
    %14 = arith.addf %12, %13 : vector<16x1xf32>
    %15 = math.rsqrt %14 : vector<16x1xf32>
    %16 = vector.broadcast %15 : vector<16x1xf32> to vector<16x128xf32>
    %17 = arith.mulf %7, %16 : vector<16x128xf32>
    %c0_6 = arith.constant 0 : index
    %c0_7 = arith.constant 0 : index
    %c0_8 = arith.constant 0 : index
    %18 = vector.load %arg3[%c0_6, %c0_7, %c0_8] : memref<1x1x128xf32, #tpu.memory_space<vmem>>, vector<1x1x128xf32>
    %19 = vector.shape_cast %18 : vector<1x1x128xf32> to vector<1x128xf32>
    %c0_9 = arith.constant 0 : index
    %c0_10 = arith.constant 0 : index
    %c0_11 = arith.constant 0 : index
    %20 = vector.load %arg4[%c0_9, %c0_10, %c0_11] : memref<1x1x128xf32, #tpu.memory_space<vmem>>, vector<1x1x128xf32>
    %21 = vector.shape_cast %20 : vector<1x1x128xf32> to vector<1x128xf32>
    %cst_12 = arith.constant 1.000000e+00 : f32
    %22 = vector.broadcast %cst_12 : f32 to vector<1x128xf32>
    %23 = arith.addf %22, %19 : vector<1x128xf32>
    %24 = vector.broadcast %23 : vector<1x128xf32> to vector<16x128xf32>
    %25 = arith.mulf %17, %24 : vector<16x128xf32>
    %26 = vector.broadcast %21 : vector<1x128xf32> to vector<16x128xf32>
    %27 = arith.addf %25, %26 : vector<16x128xf32>
    %c0_13 = arith.constant 0 : index
    %c0_14 = arith.constant 0 : index
    %c0_15 = arith.constant 0 : index
    %28 = vector.load %arg5[%c0_13, %c0_14, %c0_15] : memref<1x16x128xf32, #tpu.memory_space<vmem>>, vector<1x16x128xf32>
    %29 = vector.shape_cast %28 : vector<1x16x128xf32> to vector<16x128xf32>
    %30 = vector.shape_cast %27 : vector<16x128xf32> to vector<1x16x128xf32>
    tpu.vector_store %arg5[%c0_13, %c0_14, %c0_15], %30 {strides = array<i32>} : memref<1x16x128xf32, #tpu.memory_space<vmem>>, vector<1x16x128xf32>,
    return
  }
  func.func @transform_0(%arg0: i32, %arg1: i32) -> (i32, i32, i32) {
    %c0_i32 = arith.constant 0 : i32
    %c0_i32_0 = arith.constant 0 : i32
    return %arg0, %arg1, %c0_i32 : i32, i32, i32
  }
  func.func @transform_1(%arg0: i32, %arg1: i32) -> (i32, i32, i32) {
    %c0_i32 = arith.constant 0 : i32
    %c0_i32_0 = arith.constant 0 : i32
    %c0_i32_1 = arith.constant 0 : i32
    return %arg0, %c0_i32, %c0_i32_0 : i32, i32, i32
  }
  func.func @transform_2(%arg0: i32, %arg1: i32) -> (i32, i32, i32) {
    %c0_i32 = arith.constant 0 : i32
    %c0_i32_0 = arith.constant 0 : i32
    %c0_i32_1 = arith.constant 0 : i32
    return %arg0, %c0_i32, %c0_i32_0 : i32, i32, i32
  }
  func.func @transform_3(%arg0: i32, %arg1: i32) -> (i32, i32, i32) {
    %c0_i32 = arith.constant 0 : i32
    %c0_i32_0 = arith.constant 0 : i32
    return %arg0, %arg1, %c0_i32 : i32, i32, i32
  }
}

</mosaic_0001>

<bundles_post_ra>
// kernel: tpu_custom_call.1
= control target key start
LH: loop header
LB: loop body
LE: loop exit
PB: predicated region body
PF: predicated region fallthrough
CT: control target
= control target key end

     0   :  { %8 = vsyncpa [#allocation3], 0  ;;  %s883_s0 = inlined_call_operand.hbm [shape: f32[2,16,128], index: 0, kind: input, shape index: {}]   ;;  %s884_s1 = inlined_call_operand.hbm [shape: f32[2,1,128], index: 1, kind: input, shape index: {}]   ;;  %s885_s2 = inlined_call_operand.vmem [shape: f32[2,1,128], index: 2, kind: input, shape index: {}]   ;;  %s886_s3 = inlined_call_operand.hbm [shape: f32[2,16,128], index: 3, kind: output, shape index: {}]  }
   0x1   :  { %10 = vsyncpa [#allocation3 + $0x1], 0 }
   0x2   :  { %11 = vsyncpa [#allocation6], 0 }
   0x3   :  { %13 = vsyncpa [#allocation6 + $0x1], 0 }
   0x4   :  { %14 = vsyncpa [#allocation4], 0 }
   0x5   :  { %16 = vsyncpa [#allocation4 + $0x1], 0  ;;  %s698_s12 = smov 0   ;;  %s700_s13 = smov 0  }
   0x6   :  { %s702_s14 = smov 0   ;;  %s704_s15 = smov 0  }
   0x7   :  { %s706_s16 = smov 0   ;;  %s708_s17 = smov 0  }
   0x8 LB: > { %s435_s18 = sadd.s32 4294967295, %s669_s17   ;;  %s436_s19 = sadd.s32 4294967294, %s669_s17   ;;  %s669_s17 = sphi %s708_s17, %s22_s17   ;;  %s665_s16 = sphi %s706_s16, %s897_s16   ;;  %s661_s15 = sphi %s704_s15, %s896_s15   ;;  %s657_s14 = sphi %s702_s14, %s895_s14   ;;  %s653_s13 = sphi %s700_s13, %s894_s13   ;;  %s649_s12 = sphi %s698_s12, %s893_s12  }
   0x9   : > { %s34_s20 = sadd.s32 1, %s665_s16  ;;  %s43_s21 = sadd.s32 1, %s657_s14 }
   0xa   : > { %p36_p0 = scmp.ge.s32.totalorder %s34_s20, 2  ;;  %p50_p1 = scmp.ne.s32.totalorder %s657_s14, %s653_s13 }
   0xb   : > { %p51_p2 = scmp.eq.s32.totalorder %s669_s17, 0  ;;  %p56_p3 = scmp.ne.s32.totalorder %s653_s13, %s649_s12 }
   0xc   : > { %s899_s20 = smov (%p36_p0, %s34_s20), 0  ;;  %p57_p5 = scmp.eq.s32.totalorder %s435_s18, 0 }
   0xd   : > { %p739_p4 = por %p51_p2, %p50_p1  ;;  %s38_s23 = ssub.s32 %s665_s16, %s899_s20 }
   0xe   : > { %p134_p6 = scmp.eq.s32.totalorder %s435_s18, 1  ;;  %p41_p7 = scmp.eq.s32.totalorder %s38_s23, 0 }
   0xf   : > { %p745_p8 = por %p57_p5, %p56_p3  ;;  %p140_p10 = scmp.eq.s32.totalorder %s436_s19, 1 }
  0x10   : > { %p749_p9 = por %p134_p6, %p50_p1  ;;  %p438_p12 = scmp.ge.s32.totalorder %s669_s17, 2 }
  0x11   : > { %s754_s26 = scalar_select %p41_p7, %s657_s14, %s43_s21  }
  0x12   : > { %p756_p11 = por %p140_p10, %p56_p3  ;;  %p471_p13 = scmp.lt.s32.totalorder %s669_s17, 2 }
  0x13   : > { %s763_s28 = sand.u32 1, %s657_s14   ;;  %s452_s30 = sshll.u32 %s665_s16, 8 }
  0x14   : > { %s439_s29 = sshll.u32 %s763_s28, 4  ;;  %s172_s6 = scalar_lea.hbm %s883_s0, %s452_s30 }
  0x15   : > { %s164_s7 = scalar_lea.vmem [#allocation2], %s439_s29  ;;  %p772_p0 = pnand %p471_p13, %p739_p4 }
  0x16   : > { %s173_s8 = sshll.u32 %s164_s7, 4  ;;  %p443_p1 = scmp.ge.s32.totalorder %s669_s17, 1  ;;  %s174_s8 = int_to_ptr.vmem [resolvable:$true] %s173_s8 }
  0x17   : > { %s161_s10 = scalar_lea.sflag [#allocation3], %s763_s28  ;;  %p531_p2 = pneg %p772_p0 }
  0x18   : > { %s542_s11 = scalar_lea.vmem %s174_s8, 256  ;;  %s671_s18 = smov [#allocation2]  }
  0x19   : > { %p543_p3 = scmp.ne.s32.totalorder %s174_s8, %s542_s11  ;;  %s547_s19 = sshll.u32 %s671_s18, 4  ;;  %s548_s19 = int_to_ptr.vmem [resolvable:$false] %s547_s19 }
  0x1a   : > { %s549_s21 = scalar_lea.vmem %s548_s19, 512  ;;  %p550_p4 = scmp.lt.s32.totalorder %s174_s8, %s548_s19 }
  0x1b   : > { %p545_p5 = pnand %p543_p3, %p531_p2  ;;  %p551_p7 = scmp.lt.s32.totalorder %s549_s21, %s542_s11 }
  0x1d   : > { %p546_p6 = pneg %p545_p5  ;;  %p552_p10 = por %p551_p7, %p550_p4 }
  0x1f   : > { %p553_p13 = pnand %p552_p10, %p546_p6 }
  0x21   : > { %556 = shalt.err (!%p553_p13)
}
  0x22   : > { %s672_s22 = smov 128   ;;  %s673_s23 = smov 8  }
  0x23   : > { %463 = dma.hbm_to_vmem [thread:$0]  (!%p772_p0), %s172_s6, 256, %s174_s8, %s161_s10, %s672_s22, %s672_s22, %s673_s23  }
  0x24   : > { %p204_p3 = scmp.lt.s32.totalorder %s669_s17, 3  ;;  %s442_s29 = sshll.u32 %s665_s16, 4 }
  0x25   : > { %s191_s7 = scalar_lea.hbm %s884_s1, %s442_s29  ;;  %s186_s11 = scalar_lea.vmem [#allocation5], %s763_s28 }
  0x26   : > { %p789_p5 = pnand %p443_p1, %p204_p3  ;;  %s193_s18 = sshll.u32 %s186_s11, 4  ;;  %s194_s18 = int_to_ptr.vmem [resolvable:$true] %s193_s18 }
  0x27   : > { %s184_s19 = scalar_lea.sflag [#allocation6], %s763_s28  ;;  %s570_s21 = scalar_lea.vmem %s194_s18, 16 }
  0x28   : > { %p571_p6 = scmp.ne.s32.totalorder %s194_s18, %s570_s21  ;;  %s674_s6 = smov [#allocation5]  }
  0x29   : > { %s575_s8 = sshll.u32 %s674_s6, 4  ;;  %s576_s8 = int_to_ptr.vmem [resolvable:$false] %s575_s8 }
  0x2a   : > { %p573_p4 = pnand %p571_p6, %p531_p2  ;;  %s577_s10 = scalar_lea.vmem %s576_s8, 32 }
  0x2b   : > { %p578_p1 = scmp.lt.s32.totalorder %s194_s18, %s576_s8  ;;  %p579_p10 = scmp.lt.s32.totalorder %s577_s10, %s570_s21 }
  0x2c   : > { %p574_p7 = pneg %p573_p4 }
  0x2d   : > { %p580_p13 = por %p579_p10, %p578_p1 }
  0x2f   : > { %p581_p3 = pnand %p580_p13, %p574_p7 }
  0x31   : > { %584 = shalt.err (!%p581_p3)
}
  0x32   : > { %466 = dma.hbm_to_vmem [thread:$0]  (!%p772_p0), %s191_s7, 16, %s194_s18, %s184_s19  }
  0x33   : > { %208 = sbr.rel (%p789_p5) target bundleno = 384 (0x180), region = 32  ;;  %s806_s28 = sand.u32 (!%p789_p5), 1, %s653_s13  }
  0x34   : > { %s444_s22 = sshll.u32 (!%p789_p5), %s806_s28, 4  ;;  %s211_s23 = scalar_lea.sflag (!%p789_p5), [#allocation3], %s806_s28 }
  0x35   : > { %s214_s29 = scalar_lea.vmem (!%p789_p5), [#allocation2], %s444_s22 }
  0x38   : > { %636 = dma.done.wait (%p745_p8), %s211_s23, 256  }
  0x39   : > { %638 = vsyncadd (%p745_p8), %s211_s23, 4294967040  ;;  %s220_s9 = scalar_lea.sflag [#allocation6], %s806_s28  ;;  %s222_s30 = scalar_lea.vmem [#allocation5], %s806_s28 }
  0x3a   : > { %640 = dma.done.wait (%p745_p8), %s220_s9, 16  }
  0x3b   : > { %642 = vsyncadd (%p745_p8), %s220_s9, 4294967280  ;;  %v257_v0 = vld [vmem:[%s214_s29] sm:$0xff]  ;;  %v258_v1 = vld [vmem:[%s214_s29 + $0x8] sm:$0xff]  ;;  %v286_v14 = vlaneseq  ;;  %p253_p8 = scmp.lt.s32.totalorder %s661_s15, 1  ;;  %s453_s11 = sshll.u32 %s661_s15, 8 }
  0x3c   : > { %259 = vadd.xlane.f32.xlu0 %v257_v0  ;;  %v282_v18 = vld [vmem:[%s222_s30] sm:$0x1]  ;;  %s251_s18 = scalar_lea.vmem [#allocation7], %s444_s22  ;;  %s833_s8 = scalar_lea.hbm %s886_s3, %s453_s11 }
  0x3d   : > { %v287_v17 = vshrl.u32 %v286_v14, 7  ;;  %s254_s24 = scalar_select %p253_p8, %s661_s15, 1  ;;  %v284_v19 = vadd.f32 1.0, %v282_v18 }
  0x3e   : > { %s319_s19 = sshll.u32 %s251_s18, 4  ;;  %s304_s10 = scalar_lea.sflag [#allocation4], %s806_s28  ;;  %s835_s19 = int_to_ptr.vmem [resolvable:$true] %s319_s19 }
  0x3f   : > { %v288_v20 = vsub.s32 0, %v287_v17  ;;  %s255_s7 = scalar_lea.vmem %s885_s2, %s254_s24  ;;  %s585_s23 = scalar_lea.vmem %s835_s19, 256 }
  0x40   : > { %261 = vadd.xlane.f32.xlu0 %v258_v1  ;;  %v446_v24 = vld [vmem:[%s255_s7] ss:$0 sm:$0xff]  ;;  %p586_p0 = scmp.ne.s32.totalorder %s835_s19, %s585_s23  ;;  %s675_s15 = smov [#allocation7]  }
  0x41   : > { %v289_v21 = vrot.slane %v284_v19, %v288_v20  ;;  %s589_s22 = sshll.u32 %s675_s15, 4  ;;  %s590_s22 = int_to_ptr.vmem [resolvable:$false] %s589_s22 }
  0x42   : > { %p587_p2 = pnand %p586_p0, %p749_p9  ;;  %s591_s29 = scalar_lea.vmem %s590_s22, 512 }
  0x43   : > { %p592_p6 = scmp.lt.s32.totalorder %s835_s19, %s590_s22  ;;  %p593_p4 = scmp.lt.s32.totalorder %s591_s29, %s585_s23 }
  0x44   : > { %p588_p5 = pneg %p587_p2 }
  0x45   : > { %p594_p7 = por %p593_p4, %p592_p6 }
  0x47   : > { %p595_p1 = pnand %p594_p7, %p588_p5 }
  0xc5   : > { %v260_v2 = vpop.xlane.xlu0 %259 }
  0xc6   : > { %v264_v3 = vmul.f32 0.0078125, %v260_v2 }
  0xc8   : > { %v266_v4 = vsub.f32 %v257_v0, %v264_v3 }
  0xc9   : > { %v262_v5 = vpop.xlane.xlu0 %261 }
  0xca   : > { %v265_v6 = vmul.f32 0.0078125, %v262_v5  ;;  %v268_v7 = vmul.f32 %v266_v4, %v266_v4 }
  0xcc   : > { %v267_v8 = vsub.f32 %v258_v1, %v265_v6  ;;  %270 = vadd.xlane.f32.xlu1 %v268_v7 }
  0xce   : > { %v269_v9 = vmul.f32 %v267_v8, %v267_v8 }
  0xd0   : > { %272 = vadd.xlane.f32.xlu1 %v269_v9 }
 0x155   : > { %v271_v10 = vpop.xlane.xlu1 %270 }
 0x156   : > { %v274_v11 = vmul.f32 0.0078125, %v271_v10 }
 0x158   : > { %v276_v12 = vadd.f32 1e-05, %v274_v11 }
 0x159   : > { %v273_v13 = vpop.xlane.xlu1 %272 }
 0x15a   : > { %525 = vrsqrt.f32 %v276_v12  ;;  %v275_v15 = vmul.f32 0.0078125, %v273_v13 }
 0x15c   : > { %v277_v16 = vadd.f32 1e-05, %v275_v15 }
 0x15e   : > { %527 = vrsqrt.f32 %v277_v16 }
 0x167   : > { %v526_v22 = vpop.eup %525 }
 0x168   : > { %v280_v23 = vmul.f32 %v526_v22, %v266_v4 }
 0x16a   : > { %v291_v25 = vmul.f32 %v289_v21, %v280_v23 }
 0x16b   : > { %v528_v26 = vpop.eup %527 }
 0x16c   : > { %v299_v27 = vadd.f32 %v446_v24, %v291_v25  ;;  %v281_v28 = vmul.f32 %v528_v26, %v267_v8 }
 0x16e   : > { %v292_v29 = vmul.f32 %v289_v21, %v281_v28  ;;  %301 = vst [vmem:[%s251_s18] sm:$0xff] %v299_v27 }
 0x170   : > { %v300_v30 = vadd.f32 %v446_v24, %v292_v29 }
 0x172   : > { %302 = vst [vmem:[%s251_s18 + $0x8] sm:$0xff] %v300_v30 }
 0x173   : > { %598 = shalt.err (!%p595_p1)
}
 0x174   : > { %s599_s9 = scalar_lea.hbm %s833_s8, 256  ;;  %s603_s4 = scalar_lea.hbm %s886_s3, 512 }
 0x175   : > { %p600_p10 = scmp.ne.s32.totalorder %s833_s8, %s599_s9  ;;  %p604_p8 = scmp.lt.s32.totalorder %s833_s8, %s886_s3 }
 0x176   : > { %p605_p0 = scmp.lt.s32.totalorder %s603_s4, %s599_s9 }
 0x177   : > { %p601_p13 = pnand %p600_p10, %p749_p9 }
 0x178   : > { %p606_p2 = por %p605_p0, %p604_p8 }
 0x179   : > { %p602_p3 = pneg %p601_p13 }
 0x17b   : > { %p607_p5 = pnand %p606_p2, %p602_p3 }
 0x17d   : > { %610 = shalt.err (!%p607_p5)
}
 0x17e   : > { %s676_s11 = smov 128   ;;  %s677_s18 = smov 8  }
 0x17f   : > { %458 = dma.vmem_to_hbm [thread:$0]  (%p749_p9), %s835_s19, 256, %s833_s8, %s304_s10, %s676_s11, %s676_s11, %s677_s18  }
 0x180 PF: > { %s334_s21 = sand.u32 1, %s649_s12   ;;  %p468_p6 = pnand %p438_p12, %p756_p11 }
 0x181   : > { %s335_s6 = scalar_lea.sflag [#allocation4], %s334_s21 }
 0x182   : > { %p469_p4 = pneg %p468_p6 }
 0x184   : > { %644 = dma.done.wait (%p469_p4), %s335_s6, 256  }
 0x185   : > { %646 = vsyncadd (%p469_p4), %s335_s6, 4294967040  ;;  %s22_s17 = sadd.s32 1, %s669_s17   ;;  %s893_s12 = smov %s653_s13 }
 0x186   : > { %p19_p7 = scmp.ge.s32.totalorder %s22_s17, 4   ;;  %s894_s13 = smov %s657_s14 }
 0x187   : > { %s895_s14 = smov %s754_s26  ;;  %s896_s15 = smov %s665_s16 }
 0x188   : > { %s897_s16 = smov %s899_s20  ;;  %21 = sbr.rel (!%p19_p7) target bundleno = 8 (0x8), region = 93 }
 0x18d   :  { %340 = vsyncpa [#allocation3], 1 }
 0x18e   :  { %342 = vsyncpa [#allocation3 + $0x1], 1 }
 0x18f   :  { %343 = vsyncpa [#allocation6], 1 }
 0x190   :  { %345 = vsyncpa [#allocation6 + $0x1], 1 }
 0x191   :  { %346 = vsyncpa [#allocation4], 1 }
 0x192   :  { %348 = vsyncpa [#allocation4 + $0x1], 1 }

</bundles_post_ra>
